<compile_context>
chip_gen: v6e
topology: v6e:2x2x1
jax: 0.10.0
libtpu: 0.0.40
codegen_flags: <defaults>
</compile_context>

<pallas_src>
import jax
import jax.numpy as jnp
from jax.experimental import pallas as pl
from jax.experimental.pallas import tpu as pltpu


def _dma_flatten_kernel(x_ref, o_ref, sem):
    # Single HBM -> HBM DMA; source and destination have identical (N, F)
    # shape/dtype, so this is a straight linear copy with no VMEM round-trip.
    copy = pltpu.make_async_copy(x_ref, o_ref, sem)
    copy.start()
    copy.wait()


def flatten(x: jax.Array) -> jax.Array:
    """Pallas equivalent of FlattenLayer.forward: (N, ...) -> (N, prod(...))."""
    n = x.shape[0]
    f = 1
    for d in x.shape[1:]:
        f *= d

    # Free, metadata-only reshape (contiguous row-major) done outside the kernel.
    x2d = x.reshape(n, f)

    itemsize = jnp.dtype(x.dtype).itemsize
    return pl.pallas_call(
        _dma_flatten_kernel,
        out_shape=jax.ShapeDtypeStruct((n, f), x.dtype),
        in_specs=[pl.BlockSpec(memory_space=pl.ANY)],
        out_specs=pl.BlockSpec(memory_space=pl.ANY),
        scratch_shapes=[pltpu.SemaphoreType.DMA(())],
        cost_estimate=pl.CostEstimate(
            flops=0,
            transcendentals=0,
            bytes_accessed=2 * n * f * itemsize,
        ),
    )(x2d)


if __name__ == "__main__":
    key = jax.random.PRNGKey(0)
    # Small NCHW input consistent with a typical conv feature map.
    x = jax.random.normal(key, (2, 4, 16, 16), dtype=jnp.float32)

    out = flatten(x)
    out = jax.block_until_ready(out)

    # Reference check against plain JAX reshape (== torch .view(N, -1)).
    ref = x.reshape(x.shape[0], -1)
    assert out.shape == (2, 4 * 16 * 16), out.shape
    assert out.dtype == x.dtype
    assert jnp.array_equal(out, ref), "mismatch vs reference flatten"

    print("KERNEL_OK")
</pallas_src>

<mosaic_0001>
module attributes {stable_mosaic.version = 11 : i64} {
  func.func @_dma_flatten_kernel(%arg0: memref<2x1024xf32, #tpu.memory_space<any>>, %arg1: memref<2x1024xf32, #tpu.memory_space<any>>, %arg2: memref<!tpu.dma_semaphore, #tpu.memory_space<semaphore_mem>>) attributes {dimension_semantics = [], scalar_prefetch = 0 : i64, scratch_operands = 1 : i64, tpu.core_type = #tpu.core_type<tc>} {
    tpu.enqueue_dma source(%arg0 : memref<2x1024xf32, #tpu.memory_space<any>>) target(%arg1 : memref<2x1024xf32, #tpu.memory_space<any>>) target_semaphore(%arg2 : memref<!tpu.dma_semaphore, #tpu.memory_space<semaphore_mem>>)
    tpu.wait_dma2 semaphore(%arg2 : memref<!tpu.dma_semaphore, #tpu.memory_space<semaphore_mem>>) src(%arg0 : memref<2x1024xf32, #tpu.memory_space<any>>) dst(%arg1 : memref<2x1024xf32, #tpu.memory_space<any>>)
    return
  }
}

</mosaic_0001>

<bundles_post_ra>
// kernel: tpu_custom_call.1
= control target key start
LH: loop header
LB: loop body
LE: loop exit
PB: predicated region body
PF: predicated region fallthrough
CT: control target
= control target key end

     0   :  { %s29_s6 = smov [#allocation2]   ;;  %s30_s7 = smov 131072   ;;  %s48_s0 = inlined_call_operand.hbm [shape: f32[2,1024], index: 0, kind: input, shape index: {}]   ;;  %s49_s1 = inlined_call_operand.hbm [shape: f32[2,1024], index: 1, kind: output, shape index: {}]  }
   0x1   :  { %s31_s8 = smov 0  }
   0x2   :  { %12 = dma.general %s48_s0, 256, %s49_s1, %s29_s6, %s30_s7, [#allocation4], %s31_s8, 0  }
   0x3   :  { %27 = dma.done.wait [#allocation2], 256 }
   0x4   :  { %28 = vsyncadd [#allocation2], 4294967040 }
   0x5   :  { %17 = vsyncmov [#allocation2] }
   0x8   :  { %s18_s13 = vpop.sfrf %17 }
   0x9   :  { %p23_p0 = scmp.ne.s32.totalorder %s18_s13, 0 }
   0xb   :  { %22 = shalt.err (%p23_p0)  }

</bundles_post_ra>
